<compile_context>
chip_gen: v6e
topology: v6e:2x2x1
jax: 0.10.0
libtpu: 0.0.40
codegen_flags: <defaults>
</compile_context>

<pallas_src>
import jax
import jax.numpy as jnp
from jax.experimental import pallas as pl
from jax.experimental.pallas import tpu as pltpu


def _round_up(x, m):
    return (x + m - 1) // m * m


def _cdiv(a, b):
    return (a + b - 1) // b


def _vmem_capacity_bytes():
    try:
        info = pltpu.get_tpu_info()
        cap = int(getattr(info, "vmem_capacity_bytes", 0))
    except Exception:
        cap = 0
    if cap <= 0:
        cap = 128 * 1024 * 1024
    return max(cap, 64 * 1024 * 1024)


def _choose_tiles(n, c, itemsize, target_work_bytes):
    """Pick (tn, tc) so the f32 working tile is ~target_work_bytes."""
    elems = max(target_work_bytes // 4, 8 * 128)
    if c * 8 * 4 <= target_work_bytes:
        # Whole class axis in one tile (legal for any C via the full-dim
        # escape; no tail mask, single reduction step per batch block).
        tc = c
        tn = (elems // max(c, 128)) // 8 * 8
        tn = int(min(max(tn, 8), 4096))
    else:
        # Class axis split into 128-lane multiples (partial tail block + mask).
        tn = 64
        tc = (elems // tn) // 128 * 128
        tc = int(max(tc, 1024))
        if tc >= c:
            tc = c
    if tn >= n:
        tn = n
    # v7x megacore: when the class reduction is tiled, make sure there are at
    # least two batch blocks so the "parallel" axis shards across both cores.
    if _cdiv(n, tn) == 1 and _cdiv(c, tc) > 1 and n >= 16:
        tn = _round_up(_cdiv(n, 2), 8)
    return tn, tc


def _make_ce_kernel(c_total, tc, needs_mask):
    """Build the online cross-entropy kernel for static (C, TC, mask?)."""

    def kernel(pred_ref, label_ref, loss_ref, m_ref, l_ref, p_ref):
        # pred_ref  : (TN, TC)   logits tile (f32 or bf16)
        # label_ref : (TN, 1)    int32 labels for this batch tile
        # loss_ref  : (1, 1, TN) f32 per-sample loss (written at last C tile)
        # m_ref/l_ref/p_ref : (TN, 1) f32 running max / sum-exp / picked logit
        c_idx = pl.program_id(1)
        n_c = pl.num_programs(1)

        @pl.when(c_idx == 0)
        def _init():
            m_ref[...] = jnp.full_like(m_ref, -jnp.inf)
            l_ref[...] = jnp.zeros_like(l_ref)
            p_ref[...] = jnp.zeros_like(p_ref)

        logits = pred_ref[...]                                      # native dtype (TN, TC)
        col = jax.lax.broadcasted_iota(jnp.int32, logits.shape, 1)  # tile-local column ids

        # --- picked logit logits[i, label[i]]: labels shifted to tile-local
        #     coordinates; exactly one non-zero term per valid row, so the
        #     select may run in the raw (possibly bf16) dtype exactly.
        labels_local = label_ref[...] - c_idx * tc                  # (TN, 1) int32
        picked = jnp.where(col == labels_local, logits,
                           jnp.asarray(0.0, logits.dtype))
        p_ref[...] += jnp.sum(picked.astype(jnp.float32), axis=-1, keepdims=True)

        # --- online log-sum-exp.  The class tail (only when C % TC != 0) is
        #     masked to -inf BEFORE the max/exp so undefined columns of a
        #     partial boundary block cannot poison the result.
        if needs_mask:
            c_remaining = c_total - c_idx * tc                      # scalar
            logits = jnp.where(col < c_remaining, logits,
                               jnp.asarray(-jnp.inf, logits.dtype))
        lse_in = logits.astype(jnp.float32)
        m_prev = m_ref[...]
        m_new = jnp.maximum(m_prev, jnp.max(lse_in, axis=-1, keepdims=True))
        l_ref[...] = l_ref[...] * jnp.exp(m_prev - m_new) + jnp.sum(
            jnp.exp(lse_in - m_new), axis=-1, keepdims=True)
        m_ref[...] = m_new

        @pl.when(c_idx == n_c - 1)
        def _finalize():
            lse = m_ref[...] + jnp.log(l_ref[...])                  # (TN, 1)
            loss_ref[...] = (lse - p_ref[...]).reshape(loss_ref.shape)

    return kernel


def _per_sample_ce(pred, label, tn=None, tc=None):
    """Per-sample cross entropy via the Pallas kernel. Returns (N,) f32."""
    n, c = pred.shape
    itemsize = jnp.dtype(pred.dtype).itemsize

    vmem_cap = _vmem_capacity_bytes()
    # Counter-intuitively the smallest-VMEM chip (v7x, 64 MiB) has the fastest
    # HBM and wants the largest blocks; the target below is what still leaves
    # room for double-buffering + the kernel's f32 temporaries within 64 MiB.
    small_vmem = vmem_cap <= 64 * 1024 * 1024
    target_work = (6 if small_vmem else 8) * 1024 * 1024

    auto_tn, auto_tc = _choose_tiles(n, c, itemsize, target_work)
    tn = int(min(tn if tn is not None else auto_tn, n))
    tc = int(min(tc if tc is not None else auto_tc, c))

    n_blocks = _cdiv(n, tn)
    grid_c = _cdiv(c, tc)
    needs_mask = (c % tc) != 0

    label2d = label.astype(jnp.int32).reshape(n, 1)
    kernel = _make_ce_kernel(c_total=c, tc=tc, needs_mask=needs_mask)

    # VMEM budget from the actual footprint: double-buffered logits block plus
    # an allowance for Mosaic's (TN,TC)-sized elementwise temporaries (iota,
    # selects, f32 upcast, exp) and the small label/output/scratch buffers.
    tn_pad, tc_pad = _round_up(tn, 8), _round_up(tc, 128)
    in_block = tn_pad * tc_pad * itemsize
    work_block = tn_pad * tc_pad * 4
    vmem_limit = 2 * in_block + 4 * work_block + 8 * 1024 * 1024
    vmem_limit = int(min(max(vmem_limit, 16 * 1024 * 1024),
                         vmem_cap - 12 * 1024 * 1024))

    out = pl.pallas_call(
        kernel,
        out_shape=jax.ShapeDtypeStruct((n_blocks, 1, tn), jnp.float32),
        grid_spec=pltpu.PrefetchScalarGridSpec(
            num_scalar_prefetch=0,
            grid=(n_blocks, grid_c),
            in_specs=[
                pl.BlockSpec((tn, tc), lambda i, j: (i, j)),
                pl.BlockSpec((tn, 1), lambda i, j: (i, 0)),
            ],
            out_specs=pl.BlockSpec((1, 1, tn), lambda i, j: (i, 0, 0)),
            scratch_shapes=[
                pltpu.VMEM((tn, 1), jnp.float32),   # running max
                pltpu.VMEM((tn, 1), jnp.float32),   # running sum-exp
                pltpu.VMEM((tn, 1), jnp.float32),   # picked logit
            ],
        ),
        compiler_params=pltpu.CompilerParams(
            dimension_semantics=("parallel", "arbitrary"),
            vmem_limit_bytes=vmem_limit,
        ),
    )(pred, label2d)

    return out.reshape(n_blocks * tn)[:n]


def weight_reduce_loss(loss, weight=None, reduction="mean", avg_factor=None):
    """Mirror of mmcls weight_reduce_loss on a per-sample loss vector."""
    if weight is not None:
        loss = loss * weight.astype(jnp.float32)
    if avg_factor is None:
        if reduction == "mean":
            return jnp.mean(loss)
        elif reduction == "sum":
            return jnp.sum(loss)
        elif reduction == "none":
            return loss
        raise ValueError(f"bad reduction {reduction}")
    else:
        if reduction == "mean":
            return jnp.sum(loss) / avg_factor
        elif reduction == "none":
            return loss
        raise ValueError("avg_factor can not be used with reduction='sum'")


def cross_entropy(pred, label, weight=None, reduction="mean", avg_factor=None):
    loss = _per_sample_ce(pred, label)
    return weight_reduce_loss(loss, weight=weight, reduction=reduction,
                              avg_factor=avg_factor)


class CrossEntropyLoss:
    """JAX/Pallas port of mmcls CrossEntropyLoss (forward only)."""

    def __init__(self, reduction="mean", loss_weight=1.0):
        self.reduction = reduction
        self.loss_weight = loss_weight
        self.cls_criterion = cross_entropy

    def __call__(self, cls_score, label, weight=None, avg_factor=None,
                 reduction_override=None, **kwargs):
        assert reduction_override in (None, "none", "mean", "sum")
        reduction = reduction_override if reduction_override else self.reduction
        loss_cls = self.loss_weight * self.cls_criterion(
            cls_score, label, weight,
            reduction=reduction, avg_factor=avg_factor, **kwargs)
        return loss_cls


if __name__ == "__main__":
    key = jax.random.PRNGKey(0)
    k1, k2, k3, k4, k5 = jax.random.split(key, 5)

    # --- primary small case ([N, C] logits, like the PyTorch module) ---
    N, C = 8, 32
    cls_score = jax.random.normal(k1, (N, C), dtype=jnp.float32)
    label = jax.random.randint(k2, (N,), 0, C, dtype=jnp.int32)
    sample_weight = jax.random.uniform(k3, (N,), dtype=jnp.float32)

    module = CrossEntropyLoss(reduction="mean", loss_weight=1.0)
    loss_mean = module(cls_score, label)
    loss_avg = module(cls_score, label, weight=sample_weight, avg_factor=float(N))
    loss_none = module(cls_score, label, reduction_override="none")
    jax.block_until_ready((loss_mean, loss_avg, loss_none))

    logp = jax.nn.log_softmax(cls_score, axis=-1)
    ref_ps = -jnp.take_along_axis(logp, label[:, None], axis=-1)[:, 0]
    assert jnp.allclose(loss_none, ref_ps, atol=1e-5, rtol=1e-5)
    assert jnp.allclose(loss_mean, jnp.mean(ref_ps), atol=1e-5, rtol=1e-5)
    assert jnp.allclose(loss_avg, jnp.sum(ref_ps * sample_weight) / N,
                        atol=1e-5, rtol=1e-5)

    # --- unaligned N/C, auto tiles (single class tile, tc == C == 300) ---
    N2, C2 = 40, 300
    x2 = jax.random.normal(k4, (N2, C2), dtype=jnp.float32)
    y2 = jax.random.randint(k5, (N2,), 0, C2, dtype=jnp.int32)
    ref2 = -jnp.take_along_axis(jax.nn.log_softmax(x2, axis=-1),
                                y2[:, None], axis=-1)[:, 0]
    out_auto = _per_sample_ce(x2, y2)
    jax.block_until_ready(out_auto)
    assert jnp.allclose(out_auto, ref2, atol=1e-4, rtol=1e-4)

    # --- forced small tiles: online LSE across class tiles, in-kernel class
    #     tail mask (300 % 128 != 0) and partial batch boundary block (40 % 16)
    out_tiled = _per_sample_ce(x2, y2, tn=16, tc=128)
    jax.block_until_ready(out_tiled)
    assert jnp.allclose(out_tiled, ref2, atol=1e-4, rtol=1e-4)

    # --- bf16 logits end-to-end (select in bf16, LSE in f32) ---
    x2_bf16 = x2.astype(jnp.bfloat16)
    ref_bf16 = -jnp.take_along_axis(
        jax.nn.log_softmax(x2_bf16.astype(jnp.float32), axis=-1),
        y2[:, None], axis=-1)[:, 0]
    out_bf16 = _per_sample_ce(x2_bf16, y2, tn=16, tc=128)
    jax.block_until_ready(out_bf16)
    assert jnp.allclose(out_bf16, ref_bf16, atol=1e-3, rtol=1e-3)

    print("KERNEL_OK")
</pallas_src>

<mosaic_0001>
module attributes {stable_mosaic.version = 11 : i64} {
  func.func @kernel(%arg0: i32, %arg1: i32, %arg2: memref<8x32xf32, #tpu.memory_space<vmem>>, %arg3: memref<8x1xi32, #tpu.memory_space<vmem>>, %arg4: memref<1x1x8xf32, #tpu.memory_space<vmem>>, %arg5: memref<8x1xf32, #tpu.memory_space<vmem>>, %arg6: memref<8x1xf32, #tpu.memory_space<vmem>>, %arg7: memref<8x1xf32, #tpu.memory_space<vmem>>) attributes {dimension_semantics = [#tpu.dimension_semantics<parallel>, #tpu.dimension_semantics<arbitrary>], iteration_bounds = array<i64: 1, 1>, scalar_prefetch = 0 : i64, scratch_operands = 3 : i64, tpu.core_type = #tpu.core_type<tc>, window_params = [{transform_indices = @transform_0, window_bounds = array<i64: 8, 32>}, {transform_indices = @transform_1, window_bounds = array<i64: 8, 1>}, {transform_indices = @transform_2, window_bounds = array<i64: 1, 1, 8>}]} {
    %c0_i32 = arith.constant 0 : i32
    %0 = arith.cmpi eq, %arg1, %c0_i32 : i32
    %1 = arith.extui %0 : i1 to i32
    %c0_i32_0 = arith.constant 0 : i32
    %2 = arith.cmpi ne, %1, %c0_i32_0 : i32
    scf.if %2 {
      %cst_21 = arith.constant 0xFF800000 : f32
      %37 = vector.broadcast %cst_21 : f32 to vector<8x1xf32>
      %c0_22 = arith.constant 0 : index
      %c0_23 = arith.constant 0 : index
      %38 = vector.load %arg5[%c0_22, %c0_23] : memref<8x1xf32, #tpu.memory_space<vmem>>, vector<8x1xf32>
      tpu.vector_store %arg5[%c0_22, %c0_23], %37 {strides = array<i32>} : memref<8x1xf32, #tpu.memory_space<vmem>>, vector<8x1xf32>,
      %cst_24 = arith.constant 0.000000e+00 : f32
      %39 = vector.broadcast %cst_24 : f32 to vector<8x1xf32>
      %c0_25 = arith.constant 0 : index
      %c0_26 = arith.constant 0 : index
      %40 = vector.load %arg6[%c0_25, %c0_26] : memref<8x1xf32, #tpu.memory_space<vmem>>, vector<8x1xf32>
      tpu.vector_store %arg6[%c0_25, %c0_26], %39 {strides = array<i32>} : memref<8x1xf32, #tpu.memory_space<vmem>>, vector<8x1xf32>,
      %cst_27 = arith.constant 0.000000e+00 : f32
      %41 = vector.broadcast %cst_27 : f32 to vector<8x1xf32>
      %c0_28 = arith.constant 0 : index
      %c0_29 = arith.constant 0 : index
      %42 = vector.load %arg7[%c0_28, %c0_29] : memref<8x1xf32, #tpu.memory_space<vmem>>, vector<8x1xf32>
      tpu.vector_store %arg7[%c0_28, %c0_29], %41 {strides = array<i32>} : memref<8x1xf32, #tpu.memory_space<vmem>>, vector<8x1xf32>,
    } else {
    }
    %c0 = arith.constant 0 : index
    %c0_1 = arith.constant 0 : index
    %3 = vector.load %arg2[%c0, %c0_1] : memref<8x32xf32, #tpu.memory_space<vmem>>, vector<8x32xf32>
    %4 = tpu.iota {dimensions = array<i32: 1>} : vector<8x32xi32>
    %c0_2 = arith.constant 0 : index
    %c0_3 = arith.constant 0 : index
    %5 = vector.load %arg3[%c0_2, %c0_3] : memref<8x1xi32, #tpu.memory_space<vmem>>, vector<8x1xi32>
    %c32_i32 = arith.constant 32 : i32
    %6 = arith.muli %arg1, %c32_i32 : i32
    %7 = vector.broadcast %6 : i32 to vector<8x1xi32>
    %8 = arith.subi %5, %7 : vector<8x1xi32>
    %9 = vector.broadcast %8 : vector<8x1xi32> to vector<8x32xi32>
    %10 = arith.cmpi eq, %4, %9 : vector<8x32xi32>
    %cst = arith.constant 0.000000e+00 : f32
    %11 = vector.broadcast %cst : f32 to vector<8x32xf32>
    %12 = arith.select %10, %3, %11 : vector<8x32xi1>, vector<8x32xf32>
    %c0_4 = arith.constant 0 : index
    %c0_5 = arith.constant 0 : index
    %13 = vector.load %arg7[%c0_4, %c0_5] : memref<8x1xf32, #tpu.memory_space<vmem>>, vector<8x1xf32>
    %cst_6 = arith.constant dense<0.000000e+00> : vector<8xf32>
    %14 = vector.multi_reduction <add>, %12, %cst_6 [1] : vector<8x32xf32> to vector<8xf32>
    %15 = vector.shape_cast %14 : vector<8xf32> to vector<8x1xf32>
    %16 = arith.addf %13, %15 : vector<8x1xf32>
    %c0_7 = arith.constant 0 : index
    %c0_8 = arith.constant 0 : index
    %17 = vector.load %arg7[%c0_7, %c0_8] : memref<8x1xf32, #tpu.memory_space<vmem>>, vector<8x1xf32>
    tpu.vector_store %arg7[%c0_7, %c0_8], %16 {strides = array<i32>} : memref<8x1xf32, #tpu.memory_space<vmem>>, vector<8x1xf32>,
    %c0_9 = arith.constant 0 : index
    %c0_10 = arith.constant 0 : index
    %18 = vector.load %arg5[%c0_9, %c0_10] : memref<8x1xf32, #tpu.memory_space<vmem>>, vector<8x1xf32>
    %cst_11 = arith.constant dense<0xFF800000> : vector<8xf32>
    %19 = vector.multi_reduction <maximumf>, %3, %cst_11 [1] : vector<8x32xf32> to vector<8xf32>
    %20 = vector.shape_cast %19 : vector<8xf32> to vector<8x1xf32>
    %21 = arith.maximumf %18, %20 : vector<8x1xf32>
    %c0_12 = arith.constant 0 : index
    %c0_13 = arith.constant 0 : index
    %22 = vector.load %arg6[%c0_12, %c0_13] : memref<8x1xf32, #tpu.memory_space<vmem>>, vector<8x1xf32>
    %23 = arith.subf %18, %21 : vector<8x1xf32>
    %24 = math.exp %23 : vector<8x1xf32>
    %25 = arith.mulf %22, %24 : vector<8x1xf32>
    %26 = vector.broadcast %21 : vector<8x1xf32> to vector<8x32xf32>
    %27 = arith.subf %3, %26 : vector<8x32xf32>
    %28 = math.exp %27 : vector<8x32xf32>
    %cst_14 = arith.constant dense<0.000000e+00> : vector<8xf32>
    %29 = vector.multi_reduction <add>, %28, %cst_14 [1] : vector<8x32xf32> to vector<8xf32>
    %30 = vector.shape_cast %29 : vector<8xf32> to vector<8x1xf32>
    %31 = arith.addf %25, %30 : vector<8x1xf32>
    %c0_15 = arith.constant 0 : index
    %c0_16 = arith.constant 0 : index
    %32 = vector.load %arg6[%c0_15, %c0_16] : memref<8x1xf32, #tpu.memory_space<vmem>>, vector<8x1xf32>
    tpu.vector_store %arg6[%c0_15, %c0_16], %31 {strides = array<i32>} : memref<8x1xf32, #tpu.memory_space<vmem>>, vector<8x1xf32>,
    %c0_17 = arith.constant 0 : index
    %c0_18 = arith.constant 0 : index
    %33 = vector.load %arg5[%c0_17, %c0_18] : memref<8x1xf32, #tpu.memory_space<vmem>>, vector<8x1xf32>
    tpu.vector_store %arg5[%c0_17, %c0_18], %21 {strides = array<i32>} : memref<8x1xf32, #tpu.memory_space<vmem>>, vector<8x1xf32>,
    %c0_i32_19 = arith.constant 0 : i32
    %34 = arith.cmpi eq, %arg1, %c0_i32_19 : i32
    %35 = arith.extui %34 : i1 to i32
    %c0_i32_20 = arith.constant 0 : i32
    %36 = arith.cmpi ne, %35, %c0_i32_20 : i32
    scf.if %36 {
      %c0_21 = arith.constant 0 : index
      %c0_22 = arith.constant 0 : index
      %37 = vector.load %arg5[%c0_21, %c0_22] : memref<8x1xf32, #tpu.memory_space<vmem>>, vector<8x1xf32>
      %c0_23 = arith.constant 0 : index
      %c0_24 = arith.constant 0 : index
      %38 = vector.load %arg6[%c0_23, %c0_24] : memref<8x1xf32, #tpu.memory_space<vmem>>, vector<8x1xf32>
      %39 = math.log %38 : vector<8x1xf32>
      %40 = arith.addf %37, %39 : vector<8x1xf32>
      %c0_25 = arith.constant 0 : index
      %c0_26 = arith.constant 0 : index
      %41 = vector.load %arg7[%c0_25, %c0_26] : memref<8x1xf32, #tpu.memory_space<vmem>>, vector<8x1xf32>
      %42 = arith.subf %40, %41 : vector<8x1xf32>
      %43 = vector.shape_cast %42 : vector<8x1xf32> to vector<1x1x8xf32>
      %c0_27 = arith.constant 0 : index
      %c0_28 = arith.constant 0 : index
      %c0_29 = arith.constant 0 : index
      %44 = vector.load %arg4[%c0_27, %c0_28, %c0_29] : memref<1x1x8xf32, #tpu.memory_space<vmem>>, vector<1x1x8xf32>
      tpu.vector_store %arg4[%c0_27, %c0_28, %c0_29], %43 {strides = array<i32>} : memref<1x1x8xf32, #tpu.memory_space<vmem>>, vector<1x1x8xf32>,
    } else {
    }
    return
  }
  func.func @transform_0(%arg0: i32, %arg1: i32) -> (i32, i32) {
    %c0_i32 = arith.constant 0 : i32
    return %arg0, %arg1 : i32, i32
  }
  func.func @transform_1(%arg0: i32, %arg1: i32) -> (i32, i32) {
    %c0_i32 = arith.constant 0 : i32
    %c0_i32_0 = arith.constant 0 : i32
    return %arg0, %c0_i32 : i32, i32
  }
  func.func @transform_2(%arg0: i32, %arg1: i32) -> (i32, i32, i32) {
    %c0_i32 = arith.constant 0 : i32
    %c0_i32_0 = arith.constant 0 : i32
    %c0_i32_1 = arith.constant 0 : i32
    return %arg0, %c0_i32, %c0_i32_0 : i32, i32, i32
  }
}

</mosaic_0001>

<bundles_post_ra>
// kernel: tpu_custom_call.1
= control target key start
LH: loop header
LB: loop body
LE: loop exit
PB: predicated region body
PF: predicated region fallthrough
CT: control target
= control target key end

     0   :  { %vm33_vm0 = vcmask 261120   ;;  %s170_s0 = inlined_call_operand.vmem [shape: f32[8,32], index: 0, kind: input, shape index: {}]   ;;  %s171_s1 = inlined_call_operand.vmem [shape: s32[8,1], index: 1, kind: input, shape index: {}]   ;;  %s172_s2 = inlined_call_operand.hbm [shape: f32[1,1,8], index: 2, kind: output, shape index: {}]  }
   0x1   :  { %v20_v0 = vld [vmem:[%s170_s0] sm:$0xff] }
   0x2   :  { %7 = vsyncpa [#allocation6], 0  ;;  %v41_v1 = vsel %vm33_vm0, %v20_v0, -inf  ;;  %vm16_vm1 = vcmask 7168   ;;  %v133_v2 = vmov -inf   ;;  %v134_v3 = vmov 0  }
   0x3   :  { %42 = vmax.xlane.f32.xlu0 %v41_v1  ;;  %17 = vst.msk [vmem:[#allocation2] sm:$0xff] %vm16_vm1, %v133_v2  ;;  %104 = vset.pattern.permute.xlu1 %v134_v3  ;;  %v23_v4 = vld [vmem:[%s171_s1] sm:$0xff]  ;;  %v135_v5 = vmov 0.0   ;;  %v21_v13 = vlaneseq  ;;  %s136_s0 = smov [#allocation5]   ;;  %vm83_vm3 = vcmask 57344  }
   0x4   :  { %103 = vset.pattern.permute.xlu0 %v134_v3  ;;  %28 = vperm.xlu1 %104, %v23_v4   ;;  %18 = vst.msk [vmem:[#allocation3] sm:$0xff] %vm16_vm1, %v135_v5  ;;  %19 = vst.msk [vmem:[#allocation4] sm:$0xff] %vm16_vm1, %v135_v5  ;;  %s91_s1 = sshll.u32 %s136_s0, 4  ;;  %s92_s1 = int_to_ptr.vmem [resolvable:$true] %s91_s1 }
   0x5   :  { %v22_v14 = vand.u32 127, %v21_v13  ;;  %v79_v36 = vshrl.u32 %v21_v13, 7  ;;  %s111_s13 = scalar_lea.vmem %s92_s1, 16  ;;  %s115_s14 = scalar_lea.vmem %s92_s1, 32 }
   0x6   :  { %p112_p0 = scmp.ne.s32.totalorder %s92_s1, %s111_s13  ;;  %p116_p1 = scmp.lt.s32.totalorder %s92_s1, %s92_s1 }
   0x7   :  { %v80_v37 = vsub.s32 %v22_v14, %v79_v36  ;;  %p117_p2 = scmp.lt.s32.totalorder %s115_s14, %s111_s13 }
   0x9   :  { %p118_p3 = por %p117_p2, %p116_p1 }
   0xa   :  { %v40_v6 = vld [vmem:[#allocation2] sm:$0xff] }
   0xb   :  { %v45_v22 = vld [vmem:[#allocation3] sm:$0xff]  ;;  %v32_v26 = vld [vmem:[#allocation4] sm:$0xff]  ;;  %p119_p4 = pnand %p118_p3, %p112_p0 }
  0x7f   :  { %v29_v15 = vpop.permute.xlu1 %28 }
  0x80   :  { %vm30_vm2 = vcmp.eq.s32.totalorder %v22_v14, %v29_v15 }
  0x81   :  { %v31_v17 = vsel %vm30_vm2, %v20_v0, 0.0 }
  0x82   :  { %v34_v19 = vsel %vm33_vm0, %v31_v17, 0.0 }
  0x8c   :  { %v43_v7 = vpop.xlane.xlu0 %42 }
  0x8d   :  { %v44_v8 = vmax.f32 %v40_v6, %v43_v7 }
  0x8f   :  { %v46_v9 = vsub.f32 %v40_v6, %v44_v8  ;;  %63 = vst.msk [vmem:[#allocation2] sm:$0xff] %vm16_vm1, %v44_v8  ;;  %52 = vperm.xlu0 %103, %v44_v8  }
  0x91   :  { %v47_v20 = vmul.f32 1.442695, %v46_v9 }
  0x96   :  { %v67_v32 = vld [vmem:[#allocation2] sm:$0xff] }
 0x10a   :  { %v53_v10 = vpop.permute.xlu0 %52 }
 0x10b   :  { %v55_v11 = vsub.f32 %v20_v0, %v53_v10 }
 0x10d   :  { %v56_v12 = vmul.f32 1.442695, %v55_v11 }
 0x10f   :  { %105 = vpow2.f32 %v56_v12 }
 0x110   :  { %107 = vpow2.f32 %v47_v20 }
 0x11c   :  { %v106_v16 = vpop.eup %105 }
 0x11d   :  { %v58_v18 = vsel %vm33_vm0, %v106_v16, 0.0  ;;  %v108_v21 = vpop.eup %107 }
 0x11e   :  { %59 = vadd.xlane.f32.xlu1 %v58_v18  ;;  %v49_v23 = vmul.f32 %v108_v21, %v45_v22 }
 0x122   :  { %35 = vadd.xlane.f32.xlu1 %v34_v19 }
 0x1a7   :  { %v60_v24 = vpop.xlane.xlu1 %59 }
 0x1a8   :  { %v61_v25 = vadd.f32 %v60_v24, %v49_v23 }
 0x1aa   :  { %62 = vst.msk [vmem:[#allocation3] sm:$0xff] %vm16_vm1, %v61_v25 }
 0x1ab   :  { %v36_v27 = vpop.xlane.xlu1 %35 }
 0x1ac   :  { %v37_v28 = vadd.f32 %v36_v27, %v32_v26 }
 0x1ae   :  { %39 = vst.msk [vmem:[#allocation4] sm:$0xff] %vm16_vm1, %v37_v28 }
 0x1b1   :  { %v68_v29 = vld [vmem:[#allocation3] sm:$0xff] }
 0x1b2   :  { %109 = vlog2.f32 %v68_v29 }
 0x1b5   :  { %v72_v33 = vld [vmem:[#allocation4] sm:$0xff] }
 0x1bf   :  { %v110_v30 = vpop.eup %109 }
 0x1c0   :  { %v70_v31 = vmul.f32 0.6931472, %v110_v30 }
 0x1c2   :  { %v71_v34 = vadd.f32 %v70_v31, %v67_v32 }
 0x1c4   :  { %v73_v35 = vsub.f32 %v71_v34, %v72_v33 }
 0x1c6   :  { %76 = vperm.xlu1 %104, %v73_v35  }
 0x241   :  { %v77_v38 = vpop.permute.xlu1 %76 }
 0x242   :  { %v81_v39 = vrot.slane %v77_v38, %v80_v37 }
 0x244   :  { %84 = vst.msk [vmem:[#allocation5] sm:$0x1] %vm83_vm3, %v81_v39 }
 0x245   :  { %122 = shalt.err (!%p119_p4)
}
 0x246   :  { %94 = dma.vmem_to_hbm [thread:$0]  %s92_s1, 16, %s172_s2, [#allocation6]  }
 0x247   :  { %131 = dma.done.wait [#allocation6], 16  }
 0x248   :  { %132 = vsyncadd [#allocation6], 4294967280 }
 0x249   :  { %98 = vsyncpa [#allocation6], 1 }

</bundles_post_ra>
